<compile_context>
chip_gen: v7x
topology: tpu7x:2x2x1
jax: 0.10.0
libtpu: 0.0.40
codegen_flags: <defaults>
</compile_context>

<pallas_src>
import functools

import jax
import jax.numpy as jnp
from jax.experimental import pallas as pl
from jax.experimental.pallas import tpu as pltpu

# ----------------------------- problem sizes --------------------------------
INPUT_DIM = 64          # Simple_AE(input_dim=...)
H_DIMS = [48, 32]       # h_dims
LATENT_DIM = 16         # latent_dim
BATCH_NORM = True       # batch_norm flag (encoder); decoder always has BN
DROP_OUT = 0.1          # identity in eval mode
BN_EPS = 1e-5
BATCH = 16
LANE = 128              # vreg lane width


def _round_up(x, m):
    return ((x + m - 1) // m) * m


def _choose_tile_b(batch):
    """Rows per grid step.

    * batch <= 16: tile_b=8 so the grid has >=2 steps and v7x can shard the
      'parallel' batch axis across both TensorCores.
    * larger batches: fill the MXU rows (256 covers the 2x256 MXU on v6e/v7x
      and two passes of the 4x128 MXU on v5e) while keeping >=2 grid steps.
    """
    if batch <= 16:
        return 8
    half = _round_up((batch + 1) // 2, 8)
    return min(256, half)


# ------------------------------ Pallas kernel --------------------------------
def _ae_kernel(n_layers, emb_idx, *refs):
    """refs = (x_ref, w0, b0, ..., w_{n-1}, b_{n-1}, emb_ref, out_ref).

    Pure chain of Linear layers (eval-mode BN already folded into W/b).  Dot
    operands are cast to the weight dtype (bf16 by default); accumulation,
    bias add and sigmoid stay f32.  The embedding is emitted after layer
    `emb_idx`, the final layer output goes through sigmoid.  Everything is
    128-lane padded, so all loads/stores are lane-dense.
    """
    x_ref = refs[0]
    emb_ref = refs[1 + 2 * n_layers]
    out_ref = refs[2 + 2 * n_layers]

    h = x_ref[...]                                     # f32, lane-padded
    for li in range(n_layers):                         # static unroll (6 layers)
        w = refs[1 + 2 * li][...]
        b = refs[2 + 2 * li][...]
        h = jnp.dot(h.astype(w.dtype), w,
                    preferred_element_type=jnp.float32) + b
        if li == emb_idx:
            emb_ref[...] = h                           # lane-padded embedding
    out_ref[...] = jax.nn.sigmoid(h)                   # lane-padded reconstruction


# ------------------------------ wrapper ---------------------------------------
def simple_ae_forward(x, params, *, emb_idx, latent_dim, input_dim, tile_b=None):
    """Runs the fused AE kernel. `params` is the folded/padded flat tuple."""
    n_layers = len(params) // 2
    B, D = x.shape
    assert D == input_dim

    in_pad = params[0].shape[0]                        # lane-padded input width
    emb_pad = params[2 * emb_idx].shape[1]             # lane-padded latent width
    out_pad = params[2 * (n_layers - 1)].shape[1]      # lane-padded output width

    if tile_b is None:
        tile_b = _choose_tile_b(B)
    B_pad = _round_up(B, tile_b)
    x = jnp.pad(x, ((0, B_pad - B), (0, in_pad - D)))  # batch + lane padding

    in_specs = [pl.BlockSpec((tile_b, in_pad), lambda i: (i, 0))]
    for p in params:
        # Grid-invariant blocks (constant index map): Pallas keeps the
        # resident copy instead of re-DMAing each step; <0.5 MiB total.
        in_specs.append(pl.BlockSpec(p.shape, lambda i: (0, 0)))

    out_specs = (
        pl.BlockSpec((tile_b, emb_pad), lambda i: (i, 0)),
        pl.BlockSpec((tile_b, out_pad), lambda i: (i, 0)),
    )
    out_shape = (
        jax.ShapeDtypeStruct((B_pad, emb_pad), jnp.float32),
        jax.ShapeDtypeStruct((B_pad, out_pad), jnp.float32),
    )

    flops = 2 * B_pad * sum(
        int(params[2 * i].shape[0]) * int(params[2 * i].shape[1])
        for i in range(n_layers))
    bytes_accessed = int(
        x.dtype.itemsize * B_pad * in_pad
        + sum(int(p.size) * p.dtype.itemsize for p in params)
        + 4 * B_pad * (emb_pad + out_pad))
    transcendentals = B_pad * out_pad                  # sigmoid -> exp

    emb_p, out_p = pl.pallas_call(
        functools.partial(_ae_kernel, n_layers, emb_idx),
        out_shape=out_shape,
        grid=(B_pad // tile_b,),
        in_specs=in_specs,
        out_specs=out_specs,
        compiler_params=pltpu.CompilerParams(
            dimension_semantics=("parallel",)),
        cost_estimate=pl.CostEstimate(
            flops=flops,
            transcendentals=transcendentals,
            bytes_accessed=bytes_accessed),
    )(x, *params)

    embedding = emb_p[:B, :latent_dim]
    output = out_p[:B, :input_dim]
    return output, embedding                           # matches (output, embedding)


# --------------------------- parameter construction --------------------------
def _init_linear(key, din, dout):
    kw, kb = jax.random.split(key)
    bound = 1.0 / jnp.sqrt(jnp.float32(din))
    w = jax.random.uniform(kw, (din, dout), jnp.float32, -bound, bound)
    b = jax.random.uniform(kb, (1, dout), jnp.float32, -bound, bound)
    return w, b


def _init_bn(key, dim):
    k1, k2, k3, k4 = jax.random.split(key, 4)
    gamma = jax.random.uniform(k1, (dim,), jnp.float32, 0.5, 1.5)
    beta = 0.1 * jax.random.normal(k2, (dim,), jnp.float32)
    mean = 0.1 * jax.random.normal(k3, (dim,), jnp.float32)
    var = jax.random.uniform(k4, (dim,), jnp.float32, 0.5, 1.5)
    return gamma, beta, mean, var


def build_model(key, input_dim, h_dims, latent_dim, batch_norm):
    """Builds the Simple_AE layer list in execution order (raw, unfolded)."""
    hidden = [input_dim] + list(h_dims)
    keys = iter(jax.random.split(key, 4 * (len(hidden) + 4)))
    layers = []
    # encoder: Linear (+ BN if batch_norm) + Dropout
    for i in range(1, len(hidden)):
        w, b = _init_linear(next(keys), hidden[i - 1], hidden[i])
        bn = _init_bn(next(keys), hidden[i]) if batch_norm else None
        layers.append((w, b, bn))
    # bottleneck
    w, b = _init_linear(next(keys), hidden[-1], latent_dim)
    layers.append((w, b, None))
    emb_idx = len(layers) - 1
    # decoder_input
    w, b = _init_linear(next(keys), latent_dim, hidden[-1])
    layers.append((w, b, None))
    # decoder: Linear + BN + Dropout (BN always on, as in the PyTorch module)
    rev = hidden[::-1]
    for i in range(len(rev) - 2):
        w, b = _init_linear(next(keys), rev[i], rev[i + 1])
        bn = _init_bn(next(keys), rev[i + 1])
        layers.append((w, b, bn))
    # final: Linear + Sigmoid
    w, b = _init_linear(next(keys), rev[-2], rev[-1])
    layers.append((w, b, None))
    return layers, emb_idx


def prepare_params(layers, input_dim, *, dot_dtype=jnp.bfloat16):
    """Fold eval-mode BN into the Linear weights, pad EVERY layer width (and
    the input width) up to a multiple of 128 lanes, and store the matmul
    operands (weights) in `dot_dtype` (bf16 by default).  Biases stay f32.

    Padding is exact: padded input lanes multiply zero weight rows; padded
    output lanes get zero weight columns and zero bias, so intermediate
    padded lanes stay identically zero throughout the network.
    """
    params = []
    prev_pad = _round_up(input_dim, LANE)
    for (w, b, bn) in layers:
        if bn is not None:
            gamma, beta, mean, var = bn
            scale = gamma / jnp.sqrt(var + BN_EPS)
            shift = beta - mean * scale
            w = w * scale[None, :]
            b = b * scale[None, :] + shift[None, :]
        din, dout = w.shape
        dout_pad = _round_up(dout, LANE)
        w = jnp.pad(w, ((0, prev_pad - din), (0, dout_pad - dout)))
        b = jnp.pad(b, ((0, 0), (0, dout_pad - dout)))
        params.append(w.astype(dot_dtype))
        params.append(b.astype(jnp.float32))
        prev_pad = dout_pad
    return tuple(params)


# ------------------------------- reference ------------------------------------
def reference_forward(x, layers, emb_idx):
    """Plain-JAX eval-mode Simple_AE forward (BN applied unfolded, all f32)."""
    h = x
    emb = None
    for li, (w, b, bn) in enumerate(layers):
        h = h @ w + b
        if bn is not None:
            gamma, beta, mean, var = bn
            h = (h - mean) / jnp.sqrt(var + BN_EPS) * gamma + beta
        if li == emb_idx:
            emb = h
    return jax.nn.sigmoid(h), emb


# ----------------------------------- main ------------------------------------
if __name__ == "__main__":
    key = jax.random.PRNGKey(0)
    k_model, k_x = jax.random.split(key)

    layers, emb_idx = build_model(k_model, INPUT_DIM, H_DIMS, LATENT_DIM,
                                  BATCH_NORM)
    x = jax.random.normal(k_x, (BATCH, INPUT_DIM), jnp.float32)

    ref_out, ref_emb = reference_forward(x, layers, emb_idx)

    # ---- strict numerical check with f32 dot operands -----------------------
    params_f32 = prepare_params(layers, INPUT_DIM, dot_dtype=jnp.float32)
    out32, emb32 = simple_ae_forward(x, params_f32, emb_idx=emb_idx,
                                     latent_dim=LATENT_DIM,
                                     input_dim=INPUT_DIM)
    out32, emb32 = jax.block_until_ready((out32, emb32))
    assert out32.shape == (BATCH, INPUT_DIM)
    assert emb32.shape == (BATCH, LATENT_DIM)
    assert jnp.allclose(emb32, ref_emb, atol=1e-4, rtol=1e-4), "emb mismatch (f32)"
    assert jnp.allclose(out32, ref_out, atol=1e-4, rtol=1e-4), "out mismatch (f32)"

    # ---- default fast path: bf16 dot operands, f32 accumulate ---------------
    params_bf16 = prepare_params(layers, INPUT_DIM, dot_dtype=jnp.bfloat16)
    out16, emb16 = simple_ae_forward(x, params_bf16, emb_idx=emb_idx,
                                     latent_dim=LATENT_DIM,
                                     input_dim=INPUT_DIM)
    out16, emb16 = jax.block_until_ready((out16, emb16))
    assert out16.shape == (BATCH, INPUT_DIM)
    assert emb16.shape == (BATCH, LATENT_DIM)
    assert jnp.allclose(emb16, ref_emb, atol=5e-2, rtol=5e-2), "emb mismatch (bf16)"
    assert jnp.allclose(out16, ref_out, atol=5e-2, rtol=5e-2), "out mismatch (bf16)"

    print("KERNEL_OK")
</pallas_src>

<mosaic_0001>
module attributes {stable_mosaic.version = 11 : i64} {
  func.func @_ae_kernel(%arg0: i32, %arg1: memref<8x128xf32, #tpu.memory_space<vmem>>, %arg2: memref<128x128xf32, #tpu.memory_space<vmem>>, %arg3: memref<1x128xf32, #tpu.memory_space<vmem>>, %arg4: memref<128x128xf32, #tpu.memory_space<vmem>>, %arg5: memref<1x128xf32, #tpu.memory_space<vmem>>, %arg6: memref<128x128xf32, #tpu.memory_space<vmem>>, %arg7: memref<1x128xf32, #tpu.memory_space<vmem>>, %arg8: memref<128x128xf32, #tpu.memory_space<vmem>>, %arg9: memref<1x128xf32, #tpu.memory_space<vmem>>, %arg10: memref<128x128xf32, #tpu.memory_space<vmem>>, %arg11: memref<1x128xf32, #tpu.memory_space<vmem>>, %arg12: memref<128x128xf32, #tpu.memory_space<vmem>>, %arg13: memref<1x128xf32, #tpu.memory_space<vmem>>, %arg14: memref<8x128xf32, #tpu.memory_space<vmem>>, %arg15: memref<8x128xf32, #tpu.memory_space<vmem>>) attributes {dimension_semantics = [#tpu.dimension_semantics<parallel>], iteration_bounds = array<i64: 2>, scalar_prefetch = 0 : i64, scratch_operands = 0 : i64, tpu.core_type = #tpu.core_type<tc>, window_params = [{transform_indices = @transform_0, window_bounds = array<i64: 8, 128>}, {pipeline_mode = #tpu.pipeline_mode<synchronous>, transform_indices = @transform_1, window_bounds = array<i64: 128, 128>}, {pipeline_mode = #tpu.pipeline_mode<synchronous>, transform_indices = @transform_2, window_bounds = array<i64: 1, 128>}, {pipeline_mode = #tpu.pipeline_mode<synchronous>, transform_indices = @transform_3, window_bounds = array<i64: 128, 128>}, {pipeline_mode = #tpu.pipeline_mode<synchronous>, transform_indices = @transform_4, window_bounds = array<i64: 1, 128>}, {pipeline_mode = #tpu.pipeline_mode<synchronous>, transform_indices = @transform_5, window_bounds = array<i64: 128, 128>}, {pipeline_mode = #tpu.pipeline_mode<synchronous>, transform_indices = @transform_6, window_bounds = array<i64: 1, 128>}, {pipeline_mode = #tpu.pipeline_mode<synchronous>, transform_indices = @transform_7, window_bounds = array<i64: 128, 128>}, {pipeline_mode = #tpu.pipeline_mode<synchronous>, transform_indices = @transform_8, window_bounds = array<i64: 1, 128>}, {pipeline_mode = #tpu.pipeline_mode<synchronous>, transform_indices = @transform_9, window_bounds = array<i64: 128, 128>}, {pipeline_mode = #tpu.pipeline_mode<synchronous>, transform_indices = @transform_10, window_bounds = array<i64: 1, 128>}, {pipeline_mode = #tpu.pipeline_mode<synchronous>, transform_indices = @transform_11, window_bounds = array<i64: 128, 128>}, {pipeline_mode = #tpu.pipeline_mode<synchronous>, transform_indices = @transform_12, window_bounds = array<i64: 1, 128>}, {transform_indices = @transform_13, window_bounds = array<i64: 8, 128>}, {transform_indices = @transform_14, window_bounds = array<i64: 8, 128>}]} {
    %c0 = arith.constant 0 : index
    %c0_0 = arith.constant 0 : index
    %0 = vector.load %arg1[%c0, %c0_0] : memref<8x128xf32, #tpu.memory_space<vmem>>, vector<8x128xf32>
    %c0_1 = arith.constant 0 : index
    %c0_2 = arith.constant 0 : index
    %1 = vector.load %arg2[%c0_1, %c0_2] : memref<128x128xf32, #tpu.memory_space<vmem>>, vector<128x128xf32>
    %c0_3 = arith.constant 0 : index
    %c0_4 = arith.constant 0 : index
    %2 = vector.load %arg3[%c0_3, %c0_4] : memref<1x128xf32, #tpu.memory_space<vmem>>, vector<1x128xf32>
    %cst = arith.constant dense<0.000000e+00> : vector<8x128xf32>
    %3 = tpu.matmul %0, %1, %cst {dimension_numbers = #tpu.dot_dimension_numbers<[1], [0], [0], [1], [0, 0, 1, 1], [], []>} : vector<8x128xf32>, vector<128x128xf32>, vector<8x128xf32> -> vector<8x128xf32>
    %4 = vector.broadcast %2 : vector<1x128xf32> to vector<8x128xf32>
    %5 = arith.addf %3, %4 : vector<8x128xf32>
    %c0_5 = arith.constant 0 : index
    %c0_6 = arith.constant 0 : index
    %6 = vector.load %arg4[%c0_5, %c0_6] : memref<128x128xf32, #tpu.memory_space<vmem>>, vector<128x128xf32>
    %c0_7 = arith.constant 0 : index
    %c0_8 = arith.constant 0 : index
    %7 = vector.load %arg5[%c0_7, %c0_8] : memref<1x128xf32, #tpu.memory_space<vmem>>, vector<1x128xf32>
    %cst_9 = arith.constant dense<0.000000e+00> : vector<8x128xf32>
    %8 = tpu.matmul %5, %6, %cst_9 {dimension_numbers = #tpu.dot_dimension_numbers<[1], [0], [0], [1], [0, 0, 1, 1], [], []>} : vector<8x128xf32>, vector<128x128xf32>, vector<8x128xf32> -> vector<8x128xf32>
    %9 = vector.broadcast %7 : vector<1x128xf32> to vector<8x128xf32>
    %10 = arith.addf %8, %9 : vector<8x128xf32>
    %c0_10 = arith.constant 0 : index
    %c0_11 = arith.constant 0 : index
    %11 = vector.load %arg6[%c0_10, %c0_11] : memref<128x128xf32, #tpu.memory_space<vmem>>, vector<128x128xf32>
    %c0_12 = arith.constant 0 : index
    %c0_13 = arith.constant 0 : index
    %12 = vector.load %arg7[%c0_12, %c0_13] : memref<1x128xf32, #tpu.memory_space<vmem>>, vector<1x128xf32>
    %cst_14 = arith.constant dense<0.000000e+00> : vector<8x128xf32>
    %13 = tpu.matmul %10, %11, %cst_14 {dimension_numbers = #tpu.dot_dimension_numbers<[1], [0], [0], [1], [0, 0, 1, 1], [], []>} : vector<8x128xf32>, vector<128x128xf32>, vector<8x128xf32> -> vector<8x128xf32>
    %14 = vector.broadcast %12 : vector<1x128xf32> to vector<8x128xf32>
    %15 = arith.addf %13, %14 : vector<8x128xf32>
    %c0_15 = arith.constant 0 : index
    %c0_16 = arith.constant 0 : index
    %16 = vector.load %arg14[%c0_15, %c0_16] : memref<8x128xf32, #tpu.memory_space<vmem>>, vector<8x128xf32>
    tpu.vector_store %arg14[%c0_15, %c0_16], %15 {strides = array<i32>} : memref<8x128xf32, #tpu.memory_space<vmem>>, vector<8x128xf32>,
    %c0_17 = arith.constant 0 : index
    %c0_18 = arith.constant 0 : index
    %17 = vector.load %arg8[%c0_17, %c0_18] : memref<128x128xf32, #tpu.memory_space<vmem>>, vector<128x128xf32>
    %c0_19 = arith.constant 0 : index
    %c0_20 = arith.constant 0 : index
    %18 = vector.load %arg9[%c0_19, %c0_20] : memref<1x128xf32, #tpu.memory_space<vmem>>, vector<1x128xf32>
    %cst_21 = arith.constant dense<0.000000e+00> : vector<8x128xf32>
    %19 = tpu.matmul %15, %17, %cst_21 {dimension_numbers = #tpu.dot_dimension_numbers<[1], [0], [0], [1], [0, 0, 1, 1], [], []>} : vector<8x128xf32>, vector<128x128xf32>, vector<8x128xf32> -> vector<8x128xf32>
    %20 = vector.broadcast %18 : vector<1x128xf32> to vector<8x128xf32>
    %21 = arith.addf %19, %20 : vector<8x128xf32>
    %c0_22 = arith.constant 0 : index
    %c0_23 = arith.constant 0 : index
    %22 = vector.load %arg10[%c0_22, %c0_23] : memref<128x128xf32, #tpu.memory_space<vmem>>, vector<128x128xf32>
    %c0_24 = arith.constant 0 : index
    %c0_25 = arith.constant 0 : index
    %23 = vector.load %arg11[%c0_24, %c0_25] : memref<1x128xf32, #tpu.memory_space<vmem>>, vector<1x128xf32>
    %cst_26 = arith.constant dense<0.000000e+00> : vector<8x128xf32>
    %24 = tpu.matmul %21, %22, %cst_26 {dimension_numbers = #tpu.dot_dimension_numbers<[1], [0], [0], [1], [0, 0, 1, 1], [], []>} : vector<8x128xf32>, vector<128x128xf32>, vector<8x128xf32> -> vector<8x128xf32>
    %25 = vector.broadcast %23 : vector<1x128xf32> to vector<8x128xf32>
    %26 = arith.addf %24, %25 : vector<8x128xf32>
    %c0_27 = arith.constant 0 : index
    %c0_28 = arith.constant 0 : index
    %27 = vector.load %arg12[%c0_27, %c0_28] : memref<128x128xf32, #tpu.memory_space<vmem>>, vector<128x128xf32>
    %c0_29 = arith.constant 0 : index
    %c0_30 = arith.constant 0 : index
    %28 = vector.load %arg13[%c0_29, %c0_30] : memref<1x128xf32, #tpu.memory_space<vmem>>, vector<1x128xf32>
    %cst_31 = arith.constant dense<0.000000e+00> : vector<8x128xf32>
    %29 = tpu.matmul %26, %27, %cst_31 {dimension_numbers = #tpu.dot_dimension_numbers<[1], [0], [0], [1], [0, 0, 1, 1], [], []>} : vector<8x128xf32>, vector<128x128xf32>, vector<8x128xf32> -> vector<8x128xf32>
    %30 = vector.broadcast %28 : vector<1x128xf32> to vector<8x128xf32>
    %31 = arith.addf %29, %30 : vector<8x128xf32>
    %32 = arith.negf %31 : vector<8x128xf32>
    %33 = math.exp %32 : vector<8x128xf32>
    %cst_32 = arith.constant 1.000000e+00 : f32
    %34 = vector.broadcast %cst_32 : f32 to vector<8x128xf32>
    %35 = arith.addf %34, %33 : vector<8x128xf32>
    %36 = arith.divf %34, %35 : vector<8x128xf32>
    %c0_33 = arith.constant 0 : index
    %c0_34 = arith.constant 0 : index
    %37 = vector.load %arg15[%c0_33, %c0_34] : memref<8x128xf32, #tpu.memory_space<vmem>>, vector<8x128xf32>
    tpu.vector_store %arg15[%c0_33, %c0_34], %36 {strides = array<i32>} : memref<8x128xf32, #tpu.memory_space<vmem>>, vector<8x128xf32>,
    return
  }
  func.func @transform_0(%arg0: i32) -> (i32, i32) {
    %c0_i32 = arith.constant 0 : i32
    %c0_i32_0 = arith.constant 0 : i32
    return %arg0, %c0_i32 : i32, i32
  }
  func.func @transform_1(%arg0: i32) -> (i32, i32) {
    %c0_i32 = arith.constant 0 : i32
    %c0_i32_0 = arith.constant 0 : i32
    %c0_i32_1 = arith.constant 0 : i32
    return %c0_i32, %c0_i32_0 : i32, i32
  }
  func.func @transform_2(%arg0: i32) -> (i32, i32) {
    %c0_i32 = arith.constant 0 : i32
    %c0_i32_0 = arith.constant 0 : i32
    %c0_i32_1 = arith.constant 0 : i32
    return %c0_i32, %c0_i32_0 : i32, i32
  }
  func.func @transform_3(%arg0: i32) -> (i32, i32) {
    %c0_i32 = arith.constant 0 : i32
    %c0_i32_0 = arith.constant 0 : i32
    %c0_i32_1 = arith.constant 0 : i32
    return %c0_i32, %c0_i32_0 : i32, i32
  }
  func.func @transform_4(%arg0: i32) -> (i32, i32) {
    %c0_i32 = arith.constant 0 : i32
    %c0_i32_0 = arith.constant 0 : i32
    %c0_i32_1 = arith.constant 0 : i32
    return %c0_i32, %c0_i32_0 : i32, i32
  }
  func.func @transform_5(%arg0: i32) -> (i32, i32) {
    %c0_i32 = arith.constant 0 : i32
    %c0_i32_0 = arith.constant 0 : i32
    %c0_i32_1 = arith.constant 0 : i32
    return %c0_i32, %c0_i32_0 : i32, i32
  }
  func.func @transform_6(%arg0: i32) -> (i32, i32) {
    %c0_i32 = arith.constant 0 : i32
    %c0_i32_0 = arith.constant 0 : i32
    %c0_i32_1 = arith.constant 0 : i32
    return %c0_i32, %c0_i32_0 : i32, i32
  }
  func.func @transform_7(%arg0: i32) -> (i32, i32) {
    %c0_i32 = arith.constant 0 : i32
    %c0_i32_0 = arith.constant 0 : i32
    %c0_i32_1 = arith.constant 0 : i32
    return %c0_i32, %c0_i32_0 : i32, i32
  }
  func.func @transform_8(%arg0: i32) -> (i32, i32) {
    %c0_i32 = arith.constant 0 : i32
    %c0_i32_0 = arith.constant 0 : i32
    %c0_i32_1 = arith.constant 0 : i32
    return %c0_i32, %c0_i32_0 : i32, i32
  }
  func.func @transform_9(%arg0: i32) -> (i32, i32) {
    %c0_i32 = arith.constant 0 : i32
    %c0_i32_0 = arith.constant 0 : i32
    %c0_i32_1 = arith.constant 0 : i32
    return %c0_i32, %c0_i32_0 : i32, i32
  }
  func.func @transform_10(%arg0: i32) -> (i32, i32) {
    %c0_i32 = arith.constant 0 : i32
    %c0_i32_0 = arith.constant 0 : i32
    %c0_i32_1 = arith.constant 0 : i32
    return %c0_i32, %c0_i32_0 : i32, i32
  }
  func.func @transform_11(%arg0: i32) -> (i32, i32) {
    %c0_i32 = arith.constant 0 : i32
    %c0_i32_0 = arith.constant 0 : i32
    %c0_i32_1 = arith.constant 0 : i32
    return %c0_i32, %c0_i32_0 : i32, i32
  }
  func.func @transform_12(%arg0: i32) -> (i32, i32) {
    %c0_i32 = arith.constant 0 : i32
    %c0_i32_0 = arith.constant 0 : i32
    %c0_i32_1 = arith.constant 0 : i32
    return %c0_i32, %c0_i32_0 : i32, i32
  }
  func.func @transform_13(%arg0: i32) -> (i32, i32) {
    %c0_i32 = arith.constant 0 : i32
    %c0_i32_0 = arith.constant 0 : i32
    return %arg0, %c0_i32 : i32, i32
  }
  func.func @transform_14(%arg0: i32) -> (i32, i32) {
    %c0_i32 = arith.constant 0 : i32
    %c0_i32_0 = arith.constant 0 : i32
    return %arg0, %c0_i32 : i32, i32
  }
}

</mosaic_0001>

<bundles_post_ra>
// kernel: tpu_custom_call.1
= control target key start
LH: loop header
LB: loop body
LE: loop exit
PB: predicated region body
PF: predicated region fallthrough
CT: control target
= control target key end

     0   :  { %s2803_s0 = inlined_call_operand.hbm [shape: f32[16,128], index: 0, kind: input, shape index: {}]   ;;  %s2804_s1 = inlined_call_operand.hbm [shape: f32[128,128], index: 1, kind: input, shape index: {}]   ;;  %s2805_s2 = inlined_call_operand.vmem [shape: f32[1,128], index: 2, kind: input, shape index: {}]   ;;  %s2806_s3 = inlined_call_operand.hbm [shape: f32[128,128], index: 3, kind: input, shape index: {}]   ;;  %s2807_s4 = inlined_call_operand.vmem [shape: f32[1,128], index: 4, kind: input, shape index: {}]   ;;  %s2808_s5 = inlined_call_operand.hbm [shape: f32[128,128], index: 5, kind: input, shape index: {}]   ;;  %s2809_s6 = inlined_call_operand.vmem [shape: f32[1,128], index: 6, kind: input, shape index: {}]   ;;  %s2810_s7 = inlined_call_operand.hbm [shape: f32[128,128], index: 7, kind: input, shape index: {}]   ;;  %s2811_s8 = inlined_call_operand.vmem [shape: f32[1,128], index: 8, kind: input, shape index: {}]   ;;  %s2812_s9 = inlined_call_operand.hbm [shape: f32[128,128], index: 9, kind: input, shape index: {}]   ;;  %s2813_s10 = inlined_call_operand.vmem [shape: f32[1,128], index: 10, kind: input, shape index: {}]   ;;  %s2814_s11 = inlined_call_operand.hbm [shape: f32[128,128], index: 11, kind: input, shape index: {}]   ;;  %s2815_s12 = inlined_call_operand.vmem [shape: f32[1,128], index: 12, kind: input, shape index: {}]   ;;  %s2816_s13 = inlined_call_operand.hbm [shape: f32[16,128], index: 13, kind: output, shape index: {0}]   ;;  %s2817_s14 = inlined_call_operand.hbm [shape: f32[16,128], index: 14, kind: output, shape index: {1}]  }
   0x1   :  { %2824 = sst [smem:[#allocation23_spill]] %s2804_s1 }
   0x2   :  { %2825 = sst [smem:[#allocation24_spill]] %s2809_s6 }
   0x3   :  { %2826 = sst [smem:[#allocation25_spill]] %s2811_s8 }
   0x4   :  { %2827 = sst [smem:[#allocation26_spill]] %s2813_s10 }
   0x5   :  { %2828 = sst [smem:[#allocation27_spill]] %s2815_s12 }
   0x6   :  { %2829 = sst [smem:[#allocation28_spill]] %s2816_s13 }
   0x7   :  { %2830 = sst [smem:[#allocation29_spill]] %s2817_s14 }
   0x8   :  { %20 = vsyncpa [#allocation3], 0 }
   0x9   :  { %22 = vsyncpa [#allocation3 + $0x1], 0 }
   0xa   :  { %23 = vsyncpa [#allocation6], 0 }
   0xb   :  { %24 = vsyncpa [#allocation9], 0 }
   0xc   :  { %25 = vsyncpa [#allocation12], 0 }
   0xd   :  { %26 = vsyncpa [#allocation4], 0 }
   0xe   :  { %28 = vsyncpa [#allocation4 + $0x1], 0 }
   0xf   :  { %29 = vsyncpa [#allocation16], 0 }
  0x10   :  { %31 = vsyncpa [#allocation16 + $0x1], 0  ;;  %s2349_s29 = smov 0   ;;  %s2351_s30 = smov 0  }
  0x11   :  { %s2353_s15 = smov 0   ;;  %s2355_s16 = smov 0  }
  0x12 LB: > { %s2260_s17 = smov [#allocation5]   ;;  %s2370_s19 = sadd.s32 4294967295, %s2258_s16   ;;  %s2258_s16 = sphi %s2355_s16, %s2861_s16   ;;  %s2254_s15 = sphi %s2353_s15, %s2860_s15   ;;  %s2250_s30 = sphi %s2351_s30, %s2859_s30   ;;  %s2246_s29 = sphi %s2349_s29, %s2858_s29  }
  0x13   : > { %s384_s18 = sshll.u32 %s2260_s17, 4  ;;  %p1340_p0 = scmp.ge.s32.totalorder %s2258_s16, 1  ;;  %s2375_s18 = int_to_ptr.vmem [resolvable:$true] %s384_s18 }
  0x14   : > { %p2820_p1 = scmp.eq.s32.totalorder %s2370_s19, 0  ;;  %p372_p2 = scmp.lt.s32.totalorder %s2258_s16, 3 }
  0x15   : > { %s2261_s21 = smov [#allocation8]   ;;  %s2262_s24 = smov [#allocation11]  }
  0x16   : > { %p2377_p3 = pnand %p1340_p0, %p372_p2  ;;  %s416_s22 = sshll.u32 %s2261_s21, 4  ;;  %s2390_s22 = int_to_ptr.vmem [resolvable:$true] %s416_s22 }
  0x17   : > { %s448_s25 = sshll.u32 %s2262_s24, 4  ;;  %s2833_s1 = sld [smem:[#allocation23_spill]]  ;;  %s2392_s25 = int_to_ptr.vmem [resolvable:$true] %s448_s25 }
  0x18   : > { %s2831_s20 = scalar_select %p2377_p3, 1, 0 }
  0x19   : > { %p1859_p5 = pneg %p2377_p3 }
  0x1b   : > { %p2386_p6 = pnand %p1859_p5, %p2820_p1 }
  0x1d   : > { %s1950_s28 = scalar_lea.hbm %s2833_s1, 2048  ;;  %p2402_p8 = pneg %p2386_p6 }
  0x1e   : > { %p1951_p7 = scmp.ne.s32.totalorder %s2833_s1, %s1950_s28  ;;  %p1957_p11 = scmp.lt.u32.totalorder %s1950_s28, %s2833_s1 }
  0x20   : > { %p1953_p9 = pnand %p2402_p8, %p1951_p7 }
  0x22   : > { %p1954_p10 = pneg %p1953_p9 }
  0x24   : > { %p1959_p12 = pnand %p1957_p11, %p1954_p10 }
  0x26   : > { %1962 = shalt.err (!%p1959_p12)
}
  0x27   : > { %s1963_s14 = scalar_lea.vmem %s2375_s18, 2048  ;;  %p1971_p5 = scmp.lt.s32.totalorder %s2375_s18, %s2375_s18 }
  0x28   : > { %p1964_p13 = scmp.ne.s32.totalorder %s2375_s18, %s1963_s14  ;;  %p1972_p4 = scmp.lt.s32.totalorder %s1963_s14, %s1963_s14 }
  0x2a   : > { %p1966_p0 = pnand %p1964_p13, %p2402_p8  ;;  %p1973_p7 = por %p1972_p4, %p1971_p5 }
  0x2c   : > { %p1967_p2 = pneg %p1966_p0 }
  0x2e   : > { %p1974_p9 = pnand %p1973_p7, %p1967_p2 }
  0x30   : > { %1977 = shalt.err (!%p1974_p9)
}
  0x31   : > { %s2263_s26 = smov 128   ;;  %s2264_s12 = smov 8  }
  0x32   : > { %1862 = dma.hbm_to_vmem [thread:$0]  (!%p2386_p6), %s2833_s1, 2048, %s2375_s18, [#allocation6], %s2263_s26, %s2263_s26, %s2264_s12  }
  0x33   : > { %s1978_s14 = scalar_lea.hbm %s2808_s5, 2048 }
  0x34   : > { %p1979_p4 = scmp.ne.s32.totalorder %s2808_s5, %s1978_s14  ;;  %p1985_p12 = scmp.lt.u32.totalorder %s1978_s14, %s2808_s5 }
  0x36   : > { %p1981_p10 = pnand %p1979_p4, %p2402_p8 }
  0x38   : > { %p1982_p11 = pneg %p1981_p10 }
  0x3a   : > { %p1987_p13 = pnand %p1985_p12, %p1982_p11 }
  0x3c   : > { %1990 = shalt.err (!%p1987_p13)
}
  0x3d   : > { %s1991_s18 = scalar_lea.vmem %s2390_s22, 2048  ;;  %p1999_p7 = scmp.lt.s32.totalorder %s2390_s22, %s2390_s22 }
  0x3e   : > { %p1992_p0 = scmp.ne.s32.totalorder %s2390_s22, %s1991_s18  ;;  %p2000_p9 = scmp.lt.s32.totalorder %s1991_s18, %s1991_s18 }
  0x40   : > { %p1994_p2 = pnand %p1992_p0, %p2402_p8  ;;  %p2001_p4 = por %p2000_p9, %p1999_p7 }
  0x42   : > { %p1995_p5 = pneg %p1994_p2 }
  0x44   : > { %p2002_p10 = pnand %p2001_p4, %p1995_p5 }
  0x46   : > { %2005 = shalt.err (!%p2002_p10)
}
  0x47   : > { %1868 = dma.hbm_to_vmem [thread:$0]  (!%p2386_p6), %s2808_s5, 2048, %s2390_s22, [#allocation9], %s2263_s26, %s2263_s26, %s2264_s12  }
  0x48   : > { %s2006_s27 = scalar_lea.hbm %s2812_s9, 2048 }
  0x49   : > { %p2007_p11 = scmp.ne.s32.totalorder %s2812_s9, %s2006_s27  ;;  %p2013_p0 = scmp.lt.u32.totalorder %s2006_s27, %s2812_s9 }
  0x4b   : > { %p2009_p12 = pnand %p2007_p11, %p2402_p8 }
  0x4d   : > { %p2010_p13 = pneg %p2009_p12 }
  0x4f   : > { %p2015_p2 = pnand %p2013_p0, %p2010_p13 }
  0x51   : > { %2018 = shalt.err (!%p2015_p2)
}
  0x52   : > { %s2019_s22 = scalar_lea.vmem %s2392_s25, 2048  ;;  %p2027_p4 = scmp.lt.s32.totalorder %s2392_s25, %s2392_s25 }
  0x53   : > { %p2020_p5 = scmp.ne.s32.totalorder %s2392_s25, %s2019_s22  ;;  %p2028_p10 = scmp.lt.s32.totalorder %s2019_s22, %s2019_s22 }
  0x55   : > { %p2022_p7 = pnand %p2020_p5, %p2402_p8  ;;  %p2029_p11 = por %p2028_p10, %p2027_p4 }
  0x57   : > { %p2023_p9 = pneg %p2022_p7 }
  0x59   : > { %p2030_p12 = pnand %p2029_p11, %p2023_p9 }
  0x5b   : > { %2033 = shalt.err (!%p2030_p12)
}
  0x5c   : > { %1874 = dma.hbm_to_vmem [thread:$0]  (!%p2386_p6), %s2812_s9, 2048, %s2392_s25, [#allocation12], %s2263_s26, %s2263_s26, %s2264_s12  }
  0x5d   : > { %s2265_s8 = smov [#allocation7]   ;;  %s2266_s13 = smov [#allocation10]  }
  0x5e   : > { %s400_s10 = sshll.u32 %s2265_s8, 4  ;;  %s432_s27 = sshll.u32 %s2266_s13, 4  ;;  %s401_s10 = int_to_ptr.vmem [resolvable:$true] %s400_s10  ;;  %s433_s27 = int_to_ptr.vmem [resolvable:$true] %s432_s27 }
  0x5f   : > { %s2034_s24 = scalar_lea.hbm %s2806_s3, 2048 }
  0x60   : > { %p2035_p13 = scmp.ne.s32.totalorder %s2806_s3, %s2034_s24  ;;  %p2041_p5 = scmp.lt.u32.totalorder %s2034_s24, %s2806_s3 }
  0x62   : > { %p2037_p0 = pnand %p2035_p13, %p2402_p8 }
  0x64   : > { %p2038_p2 = pneg %p2037_p0 }
  0x66   : > { %p2043_p7 = pnand %p2041_p5, %p2038_p2 }
  0x68   : > { %2046 = shalt.err (!%p2043_p7)
}
  0x69   : > { %s2047_s25 = scalar_lea.vmem %s401_s10, 2048  ;;  %p2055_p11 = scmp.lt.s32.totalorder %s401_s10, %s401_s10 }
  0x6a   : > { %p2048_p9 = scmp.ne.s32.totalorder %s401_s10, %s2047_s25  ;;  %p2056_p12 = scmp.lt.s32.totalorder %s2047_s25, %s2047_s25 }
  0x6c   : > { %p2050_p4 = pnand %p2048_p9, %p2402_p8  ;;  %p2057_p1 = por %p2056_p12, %p2055_p11 }
  0x6e   : > { %p2051_p10 = pneg %p2050_p4 }
  0x70   : > { %p2058_p3 = pnand %p2057_p1, %p2051_p10 }
  0x72   : > { %2061 = shalt.err (!%p2058_p3)
}
  0x73   : > { %1865 = dma.hbm_to_vmem [thread:$0]  (!%p2386_p6), %s2806_s3, 2048, %s401_s10, [#allocation6], %s2263_s26, %s2263_s26, %s2264_s12  }
  0x74   : > { %s2062_s28 = scalar_lea.hbm %s2810_s7, 2048 }
  0x75   : > { %p2063_p1 = scmp.ne.s32.totalorder %s2810_s7, %s2062_s28  ;;  %p2069_p0 = scmp.lt.u32.totalorder %s2062_s28, %s2810_s7 }
  0x77   : > { %p2065_p3 = pnand %p2063_p1, %p2402_p8 }
  0x79   : > { %p2066_p13 = pneg %p2065_p3 }
  0x7b   : > { %p2071_p2 = pnand %p2069_p0, %p2066_p13 }
  0x7d   : > { %2074 = shalt.err (!%p2071_p2)
}
  0x7e   : > { %s2075_s18 = scalar_lea.vmem %s433_s27, 2048  ;;  %p2083_p4 = scmp.lt.s32.totalorder %s433_s27, %s433_s27 }
  0x7f   : > { %p2076_p5 = scmp.ne.s32.totalorder %s433_s27, %s2075_s18  ;;  %p2084_p10 = scmp.lt.s32.totalorder %s2075_s18, %s2075_s18 }
  0x81   : > { %p2078_p7 = pnand %p2076_p5, %p2402_p8  ;;  %p2085_p11 = por %p2084_p10, %p2083_p4 }
  0x83   : > { %p2079_p9 = pneg %p2078_p7 }
  0x85   : > { %p2086_p12 = pnand %p2085_p11, %p2079_p9 }
  0x87   : > { %2089 = shalt.err (!%p2086_p12)
}
  0x88   : > { %1871 = dma.hbm_to_vmem [thread:$0]  (!%p2386_p6), %s2810_s7, 2048, %s433_s27, [#allocation9], %s2263_s26, %s2263_s26, %s2264_s12  }
  0x89   : > { %s2267_s1 = smov [#allocation13]   ;;  %s2090_s28 = scalar_lea.hbm %s2814_s11, 2048 }
  0x8a   : > { %s464_s6 = sshll.u32 %s2267_s1, 4  ;;  %p2091_p1 = scmp.ne.s32.totalorder %s2814_s11, %s2090_s28  ;;  %s465_s6 = int_to_ptr.vmem [resolvable:$true] %s464_s6 }
  0x8b   : > { %p2097_p0 = scmp.lt.u32.totalorder %s2090_s28, %s2814_s11 }
  0x8c   : > { %p2093_p3 = pnand %p2091_p1, %p2402_p8 }
  0x8e   : > { %p2094_p13 = pneg %p2093_p3 }
  0x90   : > { %p2099_p2 = pnand %p2097_p0, %p2094_p13 }
  0x92   : > { %2102 = shalt.err (!%p2099_p2)
}
  0x93   : > { %s2103_s27 = scalar_lea.vmem %s465_s6, 2048  ;;  %p2111_p4 = scmp.lt.s32.totalorder %s465_s6, %s465_s6 }
  0x94   : > { %p2104_p5 = scmp.ne.s32.totalorder %s465_s6, %s2103_s27  ;;  %p2112_p10 = scmp.lt.s32.totalorder %s2103_s27, %s2103_s27 }
  0x96   : > { %p2106_p7 = pnand %p2104_p5, %p2402_p8  ;;  %p2113_p11 = por %p2112_p10, %p2111_p4 }
  0x98   : > { %p2107_p9 = pneg %p2106_p7 }
  0x9a   : > { %p2114_p12 = pnand %p2113_p11, %p2107_p9 }
  0x9c   : > { %2117 = shalt.err (!%p2114_p12)
}
  0x9d   : > { %1877 = dma.hbm_to_vmem [thread:$0]  (!%p2386_p6), %s2814_s11, 2048, %s465_s6, [#allocation12], %s2263_s26, %s2263_s26, %s2264_s12  }
  0x9e   : > { %s1339_s23 = sadd.s32 4294967294, %s2258_s16   ;;  %s2543_s21 = sadd.s32 1, %s2258_s16  }
  0x9f   : > { %s41_s25 = ssub.s32 %s2258_s16, %s2543_s21  ;;  %s44_s1 = sadd.s32 1, %s2254_s15 }
  0xa0   : > { %p42_p8 = scmp.eq.s32.totalorder %s41_s25, 0  ;;  %p51_p1 = scmp.ne.s32.totalorder %s2254_s15, %s2250_s30 }
  0xa1   : > { %p52_p3 = scmp.eq.s32.totalorder %s2258_s16, 0  ;;  %p57_p13 = scmp.ne.s32.totalorder %s2250_s30, %s2246_s29 }
  0xa2   : > { %s2554_s8 = scalar_select %p42_p8, %s2254_s15, %s44_s1  }
  0xa3   : > { %p2556_p0 = por %p52_p3, %p51_p1  ;;  %p2836_p2 = scmp.eq.s32.totalorder %s2370_s19, 0 }
  0xa4   : > { %p333_p5 = scmp.eq.s32.totalorder %s2370_s19, 1  ;;  %p339_p7 = scmp.eq.s32.totalorder %s1339_s23, 1 }
  0xa5   : > { %p2562_p6 = por %p2836_p2, %p57_p13  ;;  %p1895_p9 = scmp.lt.s32.totalorder %s2258_s16, 2 }
  0xa6   : > { %s481_s12 = sand.u32 1, %s2254_s15   ;;  %p2569_p4 = por %p333_p5, %p51_p1 }
  0xa7   : > { %p2573_p10 = por %p339_p7, %p57_p13  ;;  %s1348_s17 = sshll.u32 %s481_s12, 3 }
  0xa8   : > { %s2838_s6 = scalar_select %p2569_p4, 1, 0 }
  0xa9   : > { %s2839_s28 = scalar_select %p2573_p10, 1, 0 }
  0xaa   : > { %s1349_s24 = sshll.u32 %s2258_s16, 7  ;;  %s485_s18 = scalar_lea.vmem [#allocation2], %s1348_s17 }
  0xab   : > { %s2581_s27 = scalar_lea.hbm %s2803_s0, %s1349_s24  ;;  %s492_s10 = sshll.u32 %s485_s18, 4  ;;  %s2583_s10 = int_to_ptr.vmem [resolvable:$true] %s492_s10 }
  0xac   : > { %p2587_p11 = pnand %p1895_p9, %p2556_p0  ;;  %s482_s25 = scalar_lea.sflag [#allocation3], %s481_s12 }
  0xad   : > { %s2118_s1 = scalar_lea.hbm %s2581_s27, 128  ;;  %s2123_s14 = scalar_lea.hbm %s2803_s0, 256 }
  0xae   : > { %p2119_p12 = scmp.ne.s32.totalorder %s2581_s27, %s2118_s1  ;;  %p2120_p8 = pneg %p2587_p11 }
  0xaf   : > { %p2124_p13 = scmp.lt.u32.totalorder %s2581_s27, %s2803_s0  ;;  %p2125_p0 = scmp.lt.u32.totalorder %s2123_s14, %s2118_s1 }
  0xb0   : > { %p2121_p1 = pnand %p2120_p8, %p2119_p12  ;;  %p2127_p5 = scmp.lt.u32.totalorder %s2118_s1, %s2581_s27 }
  0xb1   : > { %p2126_p2 = por %p2125_p0, %p2124_p13 }
  0xb2   : > { %p2122_p3 = pneg %p2121_p1 }
  0xb3   : > { %p2128_p7 = por %p2127_p5, %p2126_p2 }
  0xb5   : > { %p2129_p9 = pnand %p2128_p7, %p2122_p3 }
  0xb7   : > { %2132 = shalt.err (!%p2129_p9)
}
  0xb8   : > { %s2133_s12 = scalar_lea.vmem %s2583_s10, 128  ;;  %s2268_s18 = smov [#allocation2]  }
  0xb9   : > { %p2134_p12 = scmp.ne.s32.totalorder %s2583_s10, %s2133_s12  ;;  %s2138_s17 = sshll.u32 %s2268_s18, 4  ;;  %s2139_s17 = int_to_ptr.vmem [resolvable:$false] %s2138_s17 }
  0xba   : > { %s2140_s24 = scalar_lea.vmem %s2139_s17, 256  ;;  %p2141_p4 = scmp.lt.s32.totalorder %s2583_s10, %s2139_s17 }
  0xbb   : > { %p2136_p1 = pnand %p2134_p12, %p2120_p8  ;;  %p2142_p13 = scmp.lt.s32.totalorder %s2140_s24, %s2133_s12 }
  0xbd   : > { %p2137_p10 = pneg %p2136_p1  ;;  %p2143_p0 = por %p2142_p13, %p2141_p4 }
  0xbf   : > { %p2144_p2 = pnand %p2143_p0, %p2137_p10 }
  0xc1   : > { %2147 = shalt.err (!%p2144_p2)
}
  0xc2   : > { %1881 = dma.hbm_to_vmem [thread:$0]  (!%p2587_p11), %s2581_s27, 128, %s2583_s10, %s482_s25  }
  0xc3   : > { %p2841_p3 = scmp.ne.s32.totalorder %s2831_s20, 0 }
  0xc4   : > { %s2619_s1 = sand.u32 (!%p2841_p3), 1, %s2250_s30  }
  0xc5   : > { %501 = sbr.rel (%p2841_p3) target bundleno = 1572 (0x624), region = 72  ;;  %s2622_s14 = sshll.u32 (!%p2841_p3), %s2619_s1, 3 }
  0xc6   : > { %s504_s13 = scalar_lea.sflag (!%p2841_p3), [#allocation3], %s2619_s1  ;;  %s507_s22 = scalar_lea.vmem (!%p2841_p3), [#allocation2], %s2622_s14 }
  0xcc   : > { %2221 = dma.done.wait (%p2562_p6), %s504_s13, 128  }
  0xcd   : > { %2223 = vsyncadd (%p2562_p6), %s504_s13, 4294967168  ;;  %p2842_p4 = scmp.eq.s32.totalorder %s2370_s19, 0 }
  0xcf   : > { %2225 = dma.done.wait (%p2842_p4), [#allocation6], 4096   ;;  %p2843_p10 = pmov %p2842_p4 }
  0xd0   : > { %p2844_p11 = pmov %p2842_p4 }
  0xd1   : > { %2227 = vsyncadd (%p2843_p10), [#allocation6], 4294963200 }
  0xd2   : > { %2229 = dma.done.wait (%p2844_p11), [#allocation9], 4096   ;;  %p2845_p8 = pmov %p2842_p4 }
  0xd3   : > { %p2846_p5 = pmov %p2842_p4 }
  0xd4   : > { %2231 = vsyncadd (%p2845_p8), [#allocation9], 4294963200 }
  0xd5   : > { %2233 = dma.done.wait (%p2846_p5), [#allocation12], 4096   ;;  %p2847_p7 = pmov %p2842_p4 }
  0xd6   : > { %v2269_v0 = vmov 0.0|0.0   ;;  %vm2270_vm0 = vmmov 0   ;;  %v2271_v1 = vmov 0.0   ;;  %v582_v2 = vld [vmem:[#allocation5] sm:$0xff]  ;;  %v583_v3 = vld [vmem:[#allocation5 + $0x8] sm:$0xff]  ;;  %v584_v4 = vld [vmem:[#allocation5 + $0x10] sm:$0xff] }
  0xd7   : > { %2235 = vsyncadd (%p2847_p7), [#allocation12], 4294963200  ;;  %1685 = vmatprep.subr.bf16.mxu0 %v2269_v0  ;;  %1507 = vmatprep.mubr.msk.f32.mxu0 %vm2270_vm0, %v2271_v1  ;;  %v1686_v5 = vpack.c.bf16 %v583_v3, %v582_v2  ;;  %v585_v6 = vld [vmem:[#allocation5 + $0x18] sm:$0xff]  ;;  %v586_v8 = vld [vmem:[#allocation5 + $0x20] sm:$0xff]  ;;  %s2848_s12 = sld [smem:[#allocation24_spill]]  ;;  %s573_s18 = scalar_lea.vmem [#allocation14], %s2622_s14 }
  0xd8   : > { %1709 = vmatprep.subr.bf16.mxu1 %v2269_v0  ;;  %1542 = vmatprep.mubr.msk.f32.mxu1 %vm2270_vm0, %v2271_v1  ;;  %v1689_v7 = vpack.c.bf16 %v585_v6, %v584_v4  ;;  %v587_v9 = vld [vmem:[#allocation5 + $0x28] sm:$0xff]  ;;  %v675_v10 = vld [vmem:[#allocation7] sm:$0xff]  ;;  %v677_v12 = vld [vmem:[#allocation7 + $0x10] sm:$0xff]  ;;  %s2849_s13 = sld [smem:[#allocation25_spill]]  ;;  %s2850_s26 = sld [smem:[#allocation26_spill]] }
  0xd9   : > { %1687 = vmatpush3.bf16.msra.mxu0 %v1686_v5  ;;  %v676_v11 = vld [vmem:[#allocation7 + $0x8] sm:$0xff]  ;;  %v678_v13 = vld [vmem:[#allocation7 + $0x18] sm:$0xff]  ;;  %v1692_v14 = vpack.c.bf16 %v587_v9, %v586_v8  ;;  %v588_v16 = vld [vmem:[#allocation5 + $0x30] sm:$0xff]  ;;  %s2823_s27 = sshll.u32 %s2370_s19, 7  ;;  %s2851_s25 = sld [smem:[#allocation28_spill]] }
  0xda   : > { %1688 = vmatprep.subr.bf16.mxu0 %v2269_v0  ;;  %v1710_v15 = vpack.c.bf16 %v676_v11, %v675_v10  ;;  %v589_v17 = vld [vmem:[#allocation5 + $0x38] sm:$0xff]  ;;  %v1713_v18 = vpack.c.bf16 %v678_v13, %v677_v12  ;;  %v679_v19 = vld [vmem:[#allocation7 + $0x20] sm:$0xff]  ;;  %v680_v20 = vld [vmem:[#allocation7 + $0x28] sm:$0xff]  ;;  %s1167_s17 = sshll.u32 %s573_s18, 4  ;;  %s1149_s24 = scalar_lea.sflag [#allocation4], %s2619_s1  ;;  %s1168_s17 = int_to_ptr.vmem [resolvable:$true] %s1167_s17 }
  0xdb   : > { %v1695_v21 = vpack.c.bf16 %v589_v17, %v588_v16  ;;  %v590_v22 = vld [vmem:[#allocation5 + $0x40] sm:$0xff]  ;;  %v591_v23 = vld [vmem:[#allocation5 + $0x48] sm:$0xff]  ;;  %v1716_v24 = vpack.c.bf16 %v680_v20, %v679_v19  ;;  %v681_v25 = vld [vmem:[#allocation7 + $0x30] sm:$0xff]  ;;  %p2852_p9 = scmp.ne.s32.totalorder %s2838_s6, 0 }
  0xdc   : > { %1711 = vmatpush3.bf16.msra.mxu1 %v1710_v15  ;;  %v682_v26 = vld [vmem:[#allocation7 + $0x38] sm:$0xff]  ;;  %v1698_v27 = vpack.c.bf16 %v591_v23, %v590_v22  ;;  %v592_v28 = vld [vmem:[#allocation5 + $0x50] sm:$0xff]  ;;  %v683_v31 = vld [vmem:[#allocation7 + $0x40] sm:$0xff] }
  0xdd   : > { %1690 = vmatpush3.bf16.msra.mxu0 %v1689_v7  ;;  %1712 = vmatprep.subr.bf16.mxu1 %v2269_v0  ;;  %v593_v29 = vld [vmem:[#allocation5 + $0x58] sm:$0xff]  ;;  %v1719_v30 = vpack.c.bf16 %v682_v26, %v681_v25  ;;  %v684_v32 = vld [vmem:[#allocation7 + $0x48] sm:$0xff]  ;;  %v594_v34 = vld [vmem:[#allocation5 + $0x60] sm:$0xff] }
  0xde   : > { %1691 = vmatprep.subr.bf16.mxu0 %v2269_v0  ;;  %v1701_v33 = vpack.c.bf16 %v593_v29, %v592_v28  ;;  %v595_v35 = vld [vmem:[#allocation5 + $0x68] sm:$0xff]  ;;  %v1722_v36 = vpack.c.bf16 %v684_v32, %v683_v31  ;;  %v685_v37 = vld [vmem:[#allocation7 + $0x50] sm:$0xff]  ;;  %v686_v38 = vld [vmem:[#allocation7 + $0x58] sm:$0xff] }
  0xdf   : > { %v1704_v39 = vpack.c.bf16 %v595_v35, %v594_v34  ;;  %v596_v40 = vld [vmem:[#allocation5 + $0x70] sm:$0xff]  ;;  %v597_v41 = vld [vmem:[#allocation5 + $0x78] sm:$0xff]  ;;  %v1725_v42 = vpack.c.bf16 %v686_v38, %v685_v37  ;;  %v687_v43 = vld [vmem:[#allocation7 + $0x60] sm:$0xff] }
  0xe0   : > { %1714 = vmatpush3.bf16.msra.mxu1 %v1713_v18  ;;  %v688_v44 = vld [vmem:[#allocation7 + $0x68] sm:$0xff]  ;;  %v1707_v45 = vpack.c.bf16 %v597_v41, %v596_v40  ;;  %v581_v47 = vld [vmem:[%s507_s22] sm:$0xff]  ;;  %v768_v51 = vld [vmem:[#allocation8] sm:$0xff]  ;;  %s2272_s22 = smov [#allocation14]  }
  0xe1   : > { %1693 = vmatpush3.bf16.msra.mxu0 %v1692_v14  ;;  %1715 = vmatprep.subr.bf16.mxu1 %v2269_v0  ;;  %v1728_v46 = vpack.c.bf16 %v688_v44, %v687_v43  ;;  %v689_v48 = vld [vmem:[#allocation7 + $0x70] sm:$0xff]  ;;  %v690_v49 = vld [vmem:[#allocation7 + $0x78] sm:$0xff]  ;;  %v769_v52 = vld [vmem:[#allocation8 + $0x8] sm:$0xff]  ;;  %s2152_s20 = sshll.u32 %s2272_s22, 4  ;;  %s2153_s20 = int_to_ptr.vmem [resolvable:$false] %s2152_s20 }
  0xe2   : > { %1694 = vmatprep.subr.bf16.mxu0 %v2269_v0  ;;  %v1731_v50 = vpack.c.bf16 %v690_v49, %v689_v48  ;;  %v770_v53 = vld [vmem:[#allocation8 + $0x10] sm:$0xff]  ;;  %v1734_v54 = vpack.c.bf16 %v769_v52, %v768_v51  ;;  %v771_v55 = vld [vmem:[#allocation8 + $0x18] sm:$0xff]  ;;  %v772_v57 = vld [vmem:[#allocation8 + $0x20] sm:$0xff]  ;;  %p2155_p13 = scmp.lt.s32.totalorder %s1168_s17, %s2153_s20 }
  0xe3   : > { %v1737_v56 = vpack.c.bf16 %v771_v55, %v770_v53  ;;  %v773_v58 = vld [vmem:[#allocation8 + $0x28] sm:$0xff]  ;;  %v774_v60 = vld [vmem:[#allocation8 + $0x30] sm:$0xff]  ;;  %v775_v61 = vld [vmem:[#allocation8 + $0x38] sm:$0xff] }
  0xe4   : > { %1717 = vmatpush3.bf16.msra.mxu1 %v1716_v24  ;;  %v1740_v59 = vpack.c.bf16 %v773_v58, %v772_v57  ;;  %v1743_v62 = vpack.c.bf16 %v775_v61, %v774_v60  ;;  %v776_v63 = vld [vmem:[#allocation8 + $0x40] sm:$0xff]  ;;  %v777_v2 = vld [vmem:[#allocation8 + $0x48] sm:$0xff]  ;;  %v778_v4 = vld [vmem:[#allocation8 + $0x50] sm:$0xff] }
  0xe5   : > { %1696 = vmatpush3.bf16.msra.mxu0 %v1695_v21  ;;  %1718 = vmatprep.subr.bf16.mxu1 %v2269_v0  ;;  %v1746_v3 = vpack.c.bf16 %v777_v2, %v776_v63  ;;  %v779_v5 = vld [vmem:[#allocation8 + $0x58] sm:$0xff]  ;;  %v780_v7 = vld [vmem:[#allocation8 + $0x60] sm:$0xff]  ;;  %v781_v8 = vld [vmem:[#allocation8 + $0x68] sm:$0xff] }
  0xe6   : > { %1697 = vmatprep.subr.bf16.mxu0 %v2269_v0  ;;  %v1749_v6 = vpack.c.bf16 %v779_v5, %v778_v4  ;;  %v1752_v9 = vpack.c.bf16 %v781_v8, %v780_v7  ;;  %v1360_v10 = vld [vmem:[%s2805_s2] ss:$0 sm:$0xff]  ;;  %v783_v15 = vld [vmem:[#allocation8 + $0x78] sm:$0xff]  ;;  %v862_v17 = vld [vmem:[#allocation10] sm:$0xff] }
  0xe7   : > { %v782_v14 = vld [vmem:[#allocation8 + $0x70] sm:$0xff]  ;;  %v863_v18 = vld [vmem:[#allocation10 + $0x8] sm:$0xff]  ;;  %v865_v21 = vld [vmem:[#allocation10 + $0x18] sm:$0xff] }
  0xe8   : > { %1720 = vmatpush3.bf16.msra.mxu1 %v1719_v30  ;;  %v1755_v16 = vpack.c.bf16 %v783_v15, %v782_v14  ;;  %v864_v19 = vld [vmem:[#allocation10 + $0x10] sm:$0xff]  ;;  %v1758_v20 = vpack.c.bf16 %v863_v18, %v862_v17  ;;  %v866_v23 = vld [vmem:[#allocation10 + $0x20] sm:$0xff]  ;;  %v867_v24 = vld [vmem:[#allocation10 + $0x28] sm:$0xff] }
  0xe9   : > { %1699 = vmatpush3.bf16.msra.mxu0 %v1698_v27  ;;  %1721 = vmatprep.subr.bf16.mxu1 %v2269_v0  ;;  %v1761_v22 = vpack.c.bf16 %v865_v21, %v864_v19  ;;  %v1764_v25 = vpack.c.bf16 %v867_v24, %v866_v23  ;;  %v868_v26 = vld [vmem:[#allocation10 + $0x30] sm:$0xff]  ;;  %v869_v27 = vld [vmem:[#allocation10 + $0x38] sm:$0xff]  ;;  %v870_v29 = vld [vmem:[#allocation10 + $0x40] sm:$0xff] }
  0xea   : > { %1700 = vmatprep.subr.bf16.mxu0 %v2269_v0  ;;  %v1767_v28 = vpack.c.bf16 %v869_v27, %v868_v26  ;;  %v871_v30 = vld [vmem:[#allocation10 + $0x48] sm:$0xff]  ;;  %v872_v32 = vld [vmem:[#allocation10 + $0x50] sm:$0xff]  ;;  %v874_v35 = vld [vmem:[#allocation10 + $0x60] sm:$0xff] }
  0xeb   : > { %v1770_v31 = vpack.c.bf16 %v871_v30, %v870_v29  ;;  %v1361_v38 = vld [vmem:[%s2807_s4] ss:$0 sm:$0xff]  ;;  %v877_v43 = vld [vmem:[#allocation10 + $0x78] sm:$0xff]  ;;  %v959_v51 = vld [vmem:[#allocation11 + $0x20] sm:$0xff] }
  0xec   : > { %1723 = vmatpush3.bf16.msra.mxu1 %v1722_v36  ;;  %v875_v36 = vld [vmem:[#allocation10 + $0x68] sm:$0xff]  ;;  %v958_v49 = vld [vmem:[#allocation11 + $0x18] sm:$0xff]  ;;  %v963_v57 = vld [vmem:[#allocation11 + $0x40] sm:$0xff] }
  0xed   : > { %1702 = vmatpush3.bf16.msra.mxu0 %v1701_v33  ;;  %1724 = vmatprep.subr.bf16.mxu1 %v2269_v0  ;;  %v873_v33 = vld [vmem:[#allocation10 + $0x58] sm:$0xff]  ;;  %v1776_v37 = vpack.c.bf16 %v875_v36, %v874_v35  ;;  %v960_v52 = vld [vmem:[#allocation11 + $0x28] sm:$0xff]  ;;  %v965_v60 = vld [vmem:[#allocation11 + $0x50] sm:$0xff] }
  0xee   : > { %1703 = vmatprep.subr.bf16.mxu0 %v2269_v0  ;;  %v1773_v34 = vpack.c.bf16 %v873_v33, %v872_v32  ;;  %v1788_v53 = vpack.c.bf16 %v960_v52, %v959_v51  ;;  %v962_v55 = vld [vmem:[#allocation11 + $0x38] sm:$0xff]  ;;  %v964_v58 = vld [vmem:[#allocation11 + $0x48] sm:$0xff]  ;;  %v967_v63 = vld [vmem:[#allocation11 + $0x60] sm:$0xff] }
  0xef   : > { %v966_v61 = vld [vmem:[#allocation11 + $0x58] sm:$0xff]  ;;  %v968_v2 = vld [vmem:[#allocation11 + $0x68] sm:$0xff]  ;;  %v1362_v4 = vld [vmem:[%s2848_s12] ss:$0 sm:$0xff]  ;;  %s2728_s12 = scalar_lea.hbm %s2851_s25, %s2823_s27 }
  0xf0   : > { %1726 = vmatpush3.bf16.msra.mxu1 %v1725_v42  ;;  %v876_v42 = vld [vmem:[#allocation10 + $0x70] sm:$0xff]  ;;  %v1051_v15 = vld [vmem:[#allocation13 + $0x18] sm:$0xff]  ;;  %v1052_v17 = vld [vmem:[#allocation13 + $0x20] sm:$0xff] }
  0xf1   : > { %1705 = vmatpush3.bf16.msra.mxu0 %v1704_v39  ;;  %1727 = vmatprep.subr.bf16.mxu1 %v2269_v0  ;;  %v1779_v44 = vpack.c.bf16 %v877_v43, %v876_v42  ;;  %v969_v8 = vld [vmem:[#allocation11 + $0x70] sm:$0xff]  ;;  %v1053_v18 = vld [vmem:[#allocation13 + $0x28] sm:$0xff]  ;;  %v1059_v26 = vld [vmem:[#allocation13 + $0x58] sm:$0xff] }
  0xf2   : > { %1706 = vmatprep.subr.bf16.mxu0 %v2269_v0  ;;  %v1812_v19 = vpack.c.bf16 %v1053_v18, %v1052_v17  ;;  %v1057_v23 = vld [vmem:[#allocation13 + $0x48] sm:$0xff]  ;;  %v1062_v35 = vld [vmem:[#allocation13 + $0x70] sm:$0xff]  ;;  %v1063_v36 = vld [vmem:[#allocation13 + $0x78] sm:$0xff] }
  0xf3   : > { %v1061_v29 = vld [vmem:[#allocation13 + $0x68] sm:$0xff] }
  0xf4   : > { %1729 = vmatpush3.bf16.msra.mxu1 %v1728_v46  ;;  %v956_v46 = vld [vmem:[#allocation11 + $0x8] sm:$0xff] }
  0xf5   : > { %1708 = vmatpush3.bf16.msra.mxu0 %v1707_v45  ;;  %1730 = vmatprep.subr.bf16.mxu1 %v2269_v0  ;;  %v955_v45 = vld [vmem:[#allocation11] sm:$0xff] }
  0xf6   : > { %1733 = vmatprep.subr.bf16.mxu0 %v2269_v0  ;;  %v1782_v48 = vpack.c.bf16 %v956_v46, %v955_v45 }
  0xf8   : > { %1508 = vmatmul.mubr.f32.vlgmr.msra.gmra.mrb[0].mxu0 %v581_v47  ;;  %1732 = vmatpush3.bf16.msra.mxu1 %v1731_v50  ;;  %v957_v47 = vld [vmem:[#allocation11 + $0x10] sm:$0xff] }
  0xf9   : > { %1577 = vmatprep.mubr.msk.f32.mxu0 %vm2270_vm0, %v2271_v1  ;;  %1757 = vmatprep.subr.bf16.mxu1 %v2269_v0  ;;  %v1785_v50 = vpack.c.bf16 %v958_v49, %v957_v47 }
  0xfa   : > { %1735 = vmatpush3.bf16.msra.mxu0 %v1734_v54  ;;  %v961_v54 = vld [vmem:[#allocation11 + $0x30] sm:$0xff] }
  0xfb   : > { %1736 = vmatprep.subr.bf16.mxu0 %v2269_v0 }
  0xfe   : > { %1738 = vmatpush3.bf16.msra.mxu0 %v1737_v56  ;;  %v1791_v56 = vpack.c.bf16 %v962_v55, %v961_v54 }
  0xff   : > { %1739 = vmatprep.subr.bf16.mxu0 %v2269_v0 }
 0x102   : > { %1741 = vmatpush3.bf16.msra.mxu0 %v1740_v59  ;;  %v1794_v59 = vpack.c.bf16 %v964_v58, %v963_v57 }
 0x103   : > { %1742 = vmatprep.subr.bf16.mxu0 %v2269_v0 }
 0x106   : > { %1744 = vmatpush3.bf16.msra.mxu0 %v1743_v62  ;;  %v1797_v62 = vpack.c.bf16 %v966_v61, %v965_v60 }
 0x107   : > { %1745 = vmatprep.subr.bf16.mxu0 %v2269_v0 }
 0x10a   : > { %1747 = vmatpush3.bf16.msra.mxu0 %v1746_v3  ;;  %v1800_v3 = vpack.c.bf16 %v968_v2, %v967_v63 }
 0x10b   : > { %1748 = vmatprep.subr.bf16.mxu0 %v2269_v0 }
 0x10e   : > { %1750 = vmatpush3.bf16.msra.mxu0 %v1749_v6 }
 0x10f   : > { %1751 = vmatprep.subr.bf16.mxu0 %v2269_v0 }
 0x112   : > { %1753 = vmatpush3.bf16.msra.mxu0 %v1752_v9  ;;  %v970_v9 = vld [vmem:[#allocation11 + $0x78] sm:$0xff] }
 0x113   : > { %1754 = vmatprep.subr.bf16.mxu0 %v2269_v0 }
 0x116   : > { %1756 = vmatpush3.bf16.msra.mxu0 %v1755_v16 }
 0x117   : > { %1781 = vmatprep.subr.bf16.mxu0 %v2269_v0 }
 0x1cb   : > { %v671_v11 = vpop.f32.mrb[0].mxu0 }
 0x1cc   : > { %v672_v12 = vadd.f32 %v1360_v10, %v671_v11  ;;  %v1509_v13 = vpop.f32.mrb[1].mxu0  ;;  %v1803_v10 = vpack.c.bf16 %v970_v9, %v969_v8  ;;  %v1048_v11 = vld [vmem:[#allocation13] sm:$0xff] }
 0x1cd   : > { %v1050_v13 = vld [vmem:[#allocation13 + $0x10] sm:$0xff] }
 0x1ce   : > { %1543 = vmatmul.mubr.f32.vlgmr.msra.gmra.mrb[0].mxu1 %v672_v12  ;;  %v1049_v12 = vld [vmem:[#allocation13 + $0x8] sm:$0xff]  ;;  %v1809_v16 = vpack.c.bf16 %v1051_v15, %v1050_v13 }
 0x1cf   : > { %1612 = vmatprep.mubr.msk.f32.mxu1 %vm2270_vm0, %v2271_v1  ;;  %1759 = vmatpush3.bf16.msra.mxu1 %v1758_v20  ;;  %v1806_v14 = vpack.c.bf16 %v1049_v12, %v1048_v11  ;;  %v1055_v20 = vld [vmem:[#allocation13 + $0x38] sm:$0xff] }
 0x1d0   : > { %1760 = vmatprep.subr.bf16.mxu1 %v2269_v0 }
 0x1d3   : > { %1762 = vmatpush3.bf16.msra.mxu1 %v1761_v22  ;;  %v1056_v22 = vld [vmem:[#allocation13 + $0x40] sm:$0xff] }
 0x1d4   : > { %1763 = vmatprep.subr.bf16.mxu1 %v2269_v0  ;;  %v1818_v24 = vpack.c.bf16 %v1057_v23, %v1056_v22 }
 0x1d7   : > { %1765 = vmatpush3.bf16.msra.mxu1 %v1764_v25  ;;  %v1058_v25 = vld [vmem:[#allocation13 + $0x50] sm:$0xff] }
 0x1d8   : > { %1766 = vmatprep.subr.bf16.mxu1 %v2269_v0  ;;  %v1821_v27 = vpack.c.bf16 %v1059_v26, %v1058_v25 }
 0x1db   : > { %1768 = vmatpush3.bf16.msra.mxu1 %v1767_v28  ;;  %v1060_v28 = vld [vmem:[#allocation13 + $0x60] sm:$0xff] }
 0x1dc   : > { %1769 = vmatprep.subr.bf16.mxu1 %v2269_v0  ;;  %v1824_v30 = vpack.c.bf16 %v1061_v29, %v1060_v28 }
 0x1df   : > { %1771 = vmatpush3.bf16.msra.mxu1 %v1770_v31  ;;  %v1363_v31 = vld [vmem:[%s2849_s13] ss:$0 sm:$0xff]  ;;  %s2148_s13 = scalar_lea.vmem %s1168_s17, 128 }
 0x1e0   : > { %1772 = vmatprep.subr.bf16.mxu1 %v2269_v0  ;;  %p2149_p6 = scmp.ne.s32.totalorder %s1168_s17, %s2148_s13 }
 0x1e2   : > { %p2150_p12 = pnand %p2149_p6, %p2852_p9 }
 0x1e3   : > { %1774 = vmatpush3.bf16.msra.mxu1 %v1773_v34 }
 0x1e4   : > { %1775 = vmatprep.subr.bf16.mxu1 %v2269_v0  ;;  %p2151_p1 = pneg %p2150_p12 }
 0x1e7   : > { %1777 = vmatpush3.bf16.msra.mxu1 %v1776_v37  ;;  %v1827_v37 = vpack.c.bf16 %v1063_v36, %v1062_v35 }
 0x1e8   : > { %1778 = vmatprep.subr.bf16.mxu1 %v2269_v0 }
 0x1eb   : > { %1780 = vmatpush3.bf16.msra.mxu1 %v1779_v44 }
 0x1ec   : > { %1805 = vmatprep.subr.bf16.mxu1 %v2269_v0 }
 0x2a1   : > { %v764_v39 = vpop.f32.mrb[0].mxu1 }
 0x2a2   : > { %v765_v40 = vadd.f32 %v1361_v38, %v764_v39  ;;  %v1544_v41 = vpop.f32.mrb[1].mxu1 }
 0x2a4   : > { %1578 = vmatmul.mubr.f32.vlgmr.msra.gmra.mrb[2].mxu0 %v765_v40 }
 0x2a5   : > { %1647 = vmatprep.mubr.msk.f32.mxu0 %vm2270_vm0, %v2271_v1  ;;  %1783 = vmatpush3.bf16.msra.mxu0 %v1782_v48 }
 0x2a6   : > { %1784 = vmatprep.subr.bf16.mxu0 %v2269_v0 }
 0x2a9   : > { %1786 = vmatpush3.bf16.msra.mxu0 %v1785_v50 }
 0x2aa   : > { %1787 = vmatprep.subr.bf16.mxu0 %v2269_v0 }
 0x2ad   : > { %1789 = vmatpush3.bf16.msra.mxu0 %v1788_v53 }
 0x2ae   : > { %1790 = vmatprep.subr.bf16.mxu0 %v2269_v0 }
 0x2b1   : > { %1792 = vmatpush3.bf16.msra.mxu0 %v1791_v56 }
 0x2b2   : > { %1793 = vmatprep.subr.bf16.mxu0 %v2269_v0 }
 0x2b5   : > { %1795 = vmatpush3.bf16.msra.mxu0 %v1794_v59 }
 0x2b6   : > { %1796 = vmatprep.subr.bf16.mxu0 %v2269_v0 }
 0x2b9   : > { %1798 = vmatpush3.bf16.msra.mxu0 %v1797_v62 }
 0x2ba   : > { %1799 = vmatprep.subr.bf16.mxu0 %v2269_v0 }
 0x2bd   : > { %1801 = vmatpush3.bf16.msra.mxu0 %v1800_v3 }
 0x2be   : > { %1802 = vmatprep.subr.bf16.mxu0 %v2269_v0 }
 0x2c1   : > { %1804 = vmatpush3.bf16.msra.mxu0 %v1803_v10 }
 0x377   : > { %v857_v5 = vpop.f32.mrb[2].mxu0 }
 0x378   : > { %v858_v6 = vadd.f32 %v1362_v4, %v857_v5  ;;  %v1579_v7 = vpop.f32.mrb[3].mxu0 }
 0x37a   : > { %861 = vst [vmem:[%s573_s18] sm:$0xff] %v858_v6  ;;  %1613 = vmatmul.mubr.f32.vlgmr.msra.gmra.mrb[2].mxu1 %v858_v6 }
 0x37b   : > { %1682 = vmatprep.mubr.msk.f32.mxu1 %vm2270_vm0, %v2271_v1  ;;  %1807 = vmatpush3.bf16.msra.mxu1 %v1806_v14  ;;  %v1054_v1 = vld [vmem:[#allocation13 + $0x30] sm:$0xff] }
 0x37c   : > { %1808 = vmatprep.subr.bf16.mxu1 %v2269_v0  ;;  %v1815_v21 = vpack.c.bf16 %v1055_v20, %v1054_v1 }
 0x37f   : > { %1810 = vmatpush3.bf16.msra.mxu1 %v1809_v16 }
 0x380   : > { %1811 = vmatprep.subr.bf16.mxu1 %v2269_v0 }
 0x383   : > { %1813 = vmatpush3.bf16.msra.mxu1 %v1812_v19 }
 0x384   : > { %1814 = vmatprep.subr.bf16.mxu1 %v2269_v0 }
 0x387   : > { %1816 = vmatpush3.bf16.msra.mxu1 %v1815_v21 }
 0x388   : > { %1817 = vmatprep.subr.bf16.mxu1 %v2269_v0 }
 0x38b   : > { %1819 = vmatpush3.bf16.msra.mxu1 %v1818_v24 }
 0x38c   : > { %1820 = vmatprep.subr.bf16.mxu1 %v2269_v0 }
 0x38f   : > { %1822 = vmatpush3.bf16.msra.mxu1 %v1821_v27 }
 0x390   : > { %1823 = vmatprep.subr.bf16.mxu1 %v2269_v0 }
 0x393   : > { %1825 = vmatpush3.bf16.msra.mxu1 %v1824_v30 }
 0x394   : > { %1826 = vmatprep.subr.bf16.mxu1 %v2269_v0  ;;  %v1364_v0 = vld [vmem:[%s2850_s26] ss:$0 sm:$0xff]  ;;  %s2154_s26 = scalar_lea.vmem %s2153_s20, 256 }
 0x395   : > { %p2156_p0 = scmp.lt.s32.totalorder %s2154_s26, %s2148_s13 }
 0x397   : > { %1828 = vmatpush3.bf16.msra.mxu1 %v1827_v37  ;;  %p2157_p2 = por %p2156_p0, %p2155_p13 }
 0x399   : > { %p2158_p3 = pnand %p2157_p2, %p2151_p1 }
 0x44d   : > { %v951_v32 = vpop.f32.mrb[2].mxu1 }
 0x44e   : > { %v952_v33 = vadd.f32 %v1363_v31, %v951_v32  ;;  %v1614_v34 = vpop.f32.mrb[3].mxu1 }
 0x450   : > { %1648 = vmatmul.mubr.f32.vlgmr.msra.gmra.mrb[4].mxu0 %v952_v33 }
 0x523   : > { %v1044_v38 = vpop.f32.mrb[4].mxu0 }
 0x524   : > { %v1045_v39 = vadd.f32 %v1364_v0, %v1044_v38  ;;  %v1649_v40 = vpop.f32.mrb[5].mxu0 }
 0x526   : > { %1683 = vmatmul.mubr.f32.vlgmr.msra.gmra.mrb[4].mxu1 %v1045_v39 }
 0x527   : > { %2161 = shalt.err (!%p2158_p3)
}
 0x528   : > { %s2162_s18 = scalar_lea.hbm %s2728_s12, 128  ;;  %s2166_s22 = scalar_lea.hbm %s2851_s25, 256 }
 0x529   : > { %p2163_p4 = scmp.ne.s32.totalorder %s2728_s12, %s2162_s18  ;;  %p2167_p8 = scmp.lt.u32.totalorder %s2728_s12, %s2851_s25 }
 0x52a   : > { %p2168_p5 = scmp.lt.u32.totalorder %s2166_s22, %s2162_s18  ;;  %p2170_p6 = scmp.lt.u32.totalorder %s2162_s18, %s2728_s12 }
 0x52b   : > { %p2164_p10 = pnand %p2163_p4, %p2852_p9 }
 0x52c   : > { %p2169_p7 = por %p2168_p5, %p2167_p8 }
 0x52d   : > { %p2165_p11 = pneg %p2164_p10 }
 0x52e   : > { %p2171_p12 = por %p2170_p6, %p2169_p7 }
 0x530   : > { %p2172_p1 = pnand %p2171_p12, %p2165_p11 }
 0x532   : > { %2175 = shalt.err (!%p2172_p1)
}
 0x533   : > { %1855 = dma.vmem_to_hbm [thread:$0]  (%p2852_p9), %s1168_s17, 128, %s2728_s12, %s1149_s24  }
 0x534   : > { %s2853_s10 = sld [smem:[#allocation27_spill]]  ;;  %s580_s27 = scalar_lea.vmem [#allocation15], %s2622_s14 }
 0x535   : > { %s1180_s18 = sshll.u32 %s580_s27, 4  ;;  %s2854_s23 = sshll.u32 %s2370_s19, 7  ;;  %s2761_s18 = int_to_ptr.vmem [resolvable:$true] %s1180_s18 }
 0x536   : > { %s2855_s12 = sld [smem:[#allocation29_spill]]  ;;  %s1154_s24 = scalar_lea.sflag [#allocation16], %s2619_s1 }
 0x537   : > { %s2176_s13 = scalar_lea.vmem %s2761_s18, 128  ;;  %s2273_s14 = smov [#allocation15]  }
 0x538   : > { %p2177_p13 = scmp.ne.s32.totalorder %s2761_s18, %s2176_s13  ;;  %s2180_s19 = sshll.u32 %s2273_s14, 4  ;;  %s2181_s19 = int_to_ptr.vmem [resolvable:$false] %s2180_s19 }
 0x539   : > { %s2182_s26 = scalar_lea.vmem %s2181_s19, 256  ;;  %p2183_p3 = scmp.lt.s32.totalorder %s2761_s18, %s2181_s19 }
 0x53a   : > { %v1365_v41 = vld [vmem:[%s2853_s10] ss:$0 sm:$0xff]  ;;  %p2178_p0 = pnand %p2177_p13, %p2852_p9  ;;  %p2184_p4 = scmp.lt.s32.totalorder %s2182_s26, %s2176_s13 }
 0x53c   : > { %s2759_s17 = scalar_lea.hbm %s2855_s12, %s2854_s23  ;;  %p2179_p2 = pneg %p2178_p0 }
 0x53d   : > { %p2185_p10 = por %p2184_p4, %p2183_p3 }
 0x53f   : > { %p2186_p11 = pnand %p2185_p10, %p2179_p2 }
 0x5f9   : > { %v1137_v42 = vpop.f32.mrb[4].mxu1 }
 0x5fa   : > { %v1138_v43 = vadd.f32 %v1365_v41, %v1137_v42  ;;  %v1684_v44 = vpop.f32.mrb[5].mxu1 }
 0x5fc   : > { %v1366_v45 = vmul.f32 -1.442695, %v1138_v43 }
 0x5fe   : > { %1946 = vpow2.f32 %v1366_v45 }
 0x608   : > { %v1947_v46 = vpop.eup %1946 }
 0x609   : > { %v1144_v47 = vadd.f32 1.0, %v1947_v46 }
 0x60b   : > { %1948 = vrcp.f32 %v1144_v47 }
 0x615   : > { %v1949_v48 = vpop.eup %1948 }
 0x616   : > { %1147 = vst [vmem:[%s580_s27] sm:$0xff] %v1949_v48 }
 0x617   : > { %2189 = shalt.err (!%p2186_p11)
}
 0x618   : > { %s2190_s1 = scalar_lea.hbm %s2759_s17, 128  ;;  %s2194_s23 = scalar_lea.hbm %s2855_s12, 256 }
 0x619   : > { %p2191_p8 = scmp.ne.s32.totalorder %s2759_s17, %s2190_s1  ;;  %p2195_p6 = scmp.lt.u32.totalorder %s2759_s17, %s2855_s12 }
 0x61a   : > { %p2196_p12 = scmp.lt.u32.totalorder %s2194_s23, %s2190_s1  ;;  %p2198_p13 = scmp.lt.u32.totalorder %s2190_s1, %s2759_s17 }
 0x61b   : > { %p2192_p5 = pnand %p2191_p8, %p2852_p9 }
 0x61c   : > { %p2197_p1 = por %p2196_p12, %p2195_p6 }
 0x61d   : > { %p2193_p7 = pneg %p2192_p5 }
 0x61e   : > { %p2199_p0 = por %p2198_p13, %p2197_p1 }
 0x620   : > { %p2200_p2 = pnand %p2199_p0, %p2193_p7 }
 0x622   : > { %2203 = shalt.err (!%p2200_p2)
}
 0x623   : > { %1856 = dma.vmem_to_hbm [thread:$0]  (%p2852_p9), %s2761_s18, 128, %s2759_s17, %s1154_s24  }
 0x624 PF: > { %s1192_s13 = sand.u32 1, %s2246_s29   ;;  %p2856_p3 = scmp.ne.s32.totalorder %s2839_s28, 0 }
 0x625   : > { %p2857_p4 = scmp.ge.s32.totalorder %s2258_s16, 2  ;;  %s1193_s14 = scalar_lea.sflag [#allocation4], %s1192_s13 }
 0x627   : > { %p1883_p10 = pnand %p2857_p4, %p2856_p3 }
 0x629   : > { %2237 = dma.done.wait (!%p1883_p10), %s1193_s14, 128  }
 0x62a   : > { %2239 = vsyncadd (!%p1883_p10), %s1193_s14, 4294967168  ;;  %s1202_s19 = scalar_lea.sflag [#allocation16], %s1192_s13 }
 0x62b   : > { %2241 = dma.done.wait (!%p1883_p10), %s1202_s19, 128  }
 0x62c   : > { %2243 = vsyncadd (!%p1883_p10), %s1202_s19, 4294967168  ;;  %p34_p9 = scmp.ge.s32.totalorder %s2543_s21, 4   ;;  %s2858_s29 = smov %s2250_s30 }
 0x62d   : > { %s2859_s30 = smov %s2254_s15  ;;  %s2860_s15 = smov %s2554_s8 }
 0x62e   : > { %s2861_s16 = smov %s2543_s21  ;;  %36 = sbr.rel (!%p34_p9) target bundleno = 18 (0x12), region = 158 }
 0x635   :  { %1207 = vsyncpa [#allocation3], 1 }
 0x636   :  { %1209 = vsyncpa [#allocation3 + $0x1], 1 }
 0x637   :  { %1210 = vsyncpa [#allocation6], 1 }
 0x638   :  { %1211 = vsyncpa [#allocation9], 1 }
 0x639   :  { %1212 = vsyncpa [#allocation12], 1 }
 0x63a   :  { %1213 = vsyncpa [#allocation4], 1 }
 0x63b   :  { %1215 = vsyncpa [#allocation4 + $0x1], 1 }
 0x63c   :  { %1216 = vsyncpa [#allocation16], 1 }
 0x63d   :  { %1218 = vsyncpa [#allocation16 + $0x1], 1 }

</bundles_post_ra>
